<compile_context>
chip_gen: v5e
topology: v5e:2x2
jax: 0.10.0
libtpu: 0.0.40
codegen_flags: <defaults>
</compile_context>

<pallas_src>
import functools

import jax
import jax.numpy as jnp
import numpy as np
from jax.experimental import pallas as pl
from jax.experimental.pallas import tpu as pltpu


def _round_up(x, m):
    return (x + m - 1) // m * m


def _device_kind():
    try:
        return jax.devices()[0].device_kind.lower()
    except Exception:
        return ""


def _default_use_bf16():
    # bf16 EUP exists on v6e / v7x; v5e (and older / unknown chips) keep f32 tanh.
    dk = _device_kind()
    return any(tag in dk for tag in ("v6", "v7", "7x"))


def _vmem_capacity_bytes():
    try:
        info = pltpu.get_tpu_info()
        cap = getattr(info, "vmem_capacity_bytes", None)
        if cap:
            return int(cap)
    except Exception:
        pass
    dk = _device_kind()
    if any(tag in dk for tag in ("v7", "7x")):
        return 64 * 1024 * 1024
    if any(tag in dk for tag in ("v5", "v6")):
        return 128 * 1024 * 1024
    return 64 * 1024 * 1024  # conservative fallback when the device is unknown


def _choose_tp(*, Lq, Dp, Dq_eff, Dv, vmem_cap, max_tp=512):
    """Largest Lp tile whose per-step footprint fits in ~70% of VMEM."""
    b4 = 4
    budget = int(vmem_cap * 0.70)
    # Grid-invariant residents (hq, hq^T, W1^T, W2), x2 for default
    # double-buffering, plus the (Dv, Lq) sq^T temporary.
    fixed = 2 * (Lq * Dq_eff + Dq_eff * Lq + Dv * Dq_eff + Dp * Dv) * b4
    fixed += Dv * Lq * b4
    # Bytes that scale with tp: hp / out blocks (x2 buffers), sp, score scratch,
    # exp tile and headroom for the chunk accumulators / normalized tile.
    per_row = (2 * Dp + 2 * Dq_eff + Dv + 4 * Lq) * b4
    if budget <= fixed:
        return 8
    tp = (budget - fixed) // per_row
    tp = max(8, min(int(tp), max_tp))
    return (tp // 8) * 8


def _concat_attn_kernel(hq_ref, hqt_ref, hp_ref, w1t_ref, w2_ref, v_ref,
                        out_ref, s_ref, *, tanh_dtype, row_chunk, col_chunk):
    hq = hq_ref[0]              # (Lq, Dq_eff)  final-matmul RHS (bf16 on v6e/v7x)
    hqt = hqt_ref[0]            # (Dq_eff, Lq)  f32, for the sq projection
    hp = hp_ref[0]              # (tp, Dp)      f32
    w1t = w1t_ref[...]          # (Dv, Dq_eff)  f32
    w2 = w2_ref[...]            # (Dp, Dv)      f32

    # Projections on the MXU with f32 accumulation.  sq is produced directly in
    # the transposed (Dv, Lq) layout the score loop consumes - no XLU transpose.
    sq_t = jnp.dot(w1t, hqt, preferred_element_type=jnp.float32)    # (Dv, Lq)
    sp = jnp.dot(hp, w2, preferred_element_type=jnp.float32)        # (tp, Dv)

    tp, dv = sp.shape
    lq = sq_t.shape[1]

    # bf16 tanh operands on v6e/v7x (bf16 EUP); f32 elsewhere.  Accumulation f32.
    sp_c = sp.astype(tanh_dtype)
    sq_c = sq_t.astype(tanh_dtype)

    # v weights as SMEM scalars, loaded once (scalar operands are free filler).
    v_w = [v_ref[0, d] for d in range(dv)]

    # s[p, q] = sum_d v[d] * tanh(sp[p, d] + sq[q, d])
    # Accumulated in (row_chunk x col_chunk) register-resident sub-tiles over
    # the whole (statically unrolled) d loop; each finished chunk is written to
    # the VMEM score scratch exactly once.
    # TODO(synk): for very large Dv (>~128) chunk d with a lax.fori_loop to
    # bound code size; for multi-K Lq add a third grid axis with flash-style
    # online softmax so the score scratch stays bounded on v7x's 64 MiB VMEM.
    for r0 in range(0, tp, row_chunk):
        r1 = min(r0 + row_chunk, tp)
        for c0 in range(0, lq, col_chunk):
            c1 = min(c0 + col_chunk, lq)
            acc = jnp.zeros((r1 - r0, c1 - c0), jnp.float32)
            for d in range(dv):
                t = jnp.tanh(sp_c[r0:r1, d:d + 1] + sq_c[d:d + 1, c0:c1])
                acc = acc + v_w[d] * t.astype(jnp.float32)
            s_ref[r0:r1, c0:c1] = acc

    s = s_ref[...]                                                  # (tp, Lq) f32

    # Numerically-stable softmax over Lq (PyTorch dim=2).  Normalization uses
    # an EUP approx reciprocal + one Newton step on the (tp, 1) column.
    m = jnp.max(s, axis=1, keepdims=True)
    e = jnp.exp(s - m)
    denom = jnp.sum(e, axis=1, keepdims=True)
    inv = pl.reciprocal(denom, approx=True)
    inv = inv * (2.0 - denom * inv)                                 # ~f32 accuracy

    dq_eff = hq.shape[1]
    mxu_dtype = hq.dtype
    if lq > dq_eff:
        # Normalize after the matmul: tp*Dq_eff multiplies instead of tp*Lq.
        ctx = jnp.dot(e.astype(mxu_dtype), hq, preferred_element_type=jnp.float32)
        out = ctx * inv
    else:
        a = (e * inv).astype(mxu_dtype)
        out = jnp.dot(a, hq, preferred_element_type=jnp.float32)
    out_ref[0] = out.astype(out_ref.dtype)


def concat_attention(hq, hp, w1, w2, v, *, tp=None, use_bf16=None):
    """hq: (B, Lq, Dq), hp: (B, Lp, Dp), w1: (Dq, Dv), w2: (Dp, Dv), v: (1, Dv).
    Returns (B, Lp, Dq) = softmax_q(v . tanh(hp@W2 (+) hq@W1)) @ hq."""
    B, Lq, Dq = hq.shape
    Bp, Lp, Dp = hp.shape
    Dv = w1.shape[1]
    assert Bp == B and w1.shape == (Dq, Dv) and w2.shape == (Dp, Dv)
    assert v.shape == (1, Dv)

    if use_bf16 is None:
        use_bf16 = _default_use_bf16()
    vmem_cap = _vmem_capacity_bytes()

    # Lane-dense output padding only when the inflation is modest (<= 2x);
    # small Dq keeps masked stores instead of 8x more HBM write traffic.
    Dq128 = _round_up(Dq, 128)
    Dq_eff = Dq128 if (Dq % 128 != 0 and Dq128 <= 2 * Dq) else Dq

    if tp is None:
        tp = _choose_tp(Lq=Lq, Dp=Dp, Dq_eff=Dq_eff, Dv=Dv, vmem_cap=vmem_cap)
    tp = min(int(tp), _round_up(Lp, 8))
    tp = max(8, (tp // 8) * 8)
    if B == 1 and Lp > 8:
        # v7x has 2 TensorCores sharing the grid: keep >= 2 parallel Lp tiles.
        tp = min(tp, max(8, _round_up((Lp + 1) // 2, 8)))
    Lp_pad = _round_up(Lp, tp)
    n_p = Lp_pad // tp

    f32 = jnp.float32
    mm_dtype = jnp.bfloat16 if use_bf16 else hq.dtype

    # --- wrapper-side layout plumbing (semantically neutral zero padding) ---
    hq_p = hq if Dq_eff == Dq else jnp.pad(hq, ((0, 0), (0, 0), (0, Dq_eff - Dq)))
    hq_mm = hq_p.astype(mm_dtype)                       # final-matmul RHS copy
    hq_t = jnp.transpose(hq_p, (0, 2, 1)).astype(f32)   # (B, Dq_eff, Lq)
    w1_t = w1.T.astype(f32)                             # (Dv, Dq)
    if Dq_eff != Dq:
        w1_t = jnp.pad(w1_t, ((0, 0), (0, Dq_eff - Dq)))
    hp_p = hp if Lp_pad == Lp else jnp.pad(hp, ((0, 0), (0, Lp_pad - Lp), (0, 0)))
    hp_p = hp_p.astype(f32)
    w2_f = w2.astype(f32)
    v_f = v.astype(f32)

    kernel = functools.partial(
        _concat_attn_kernel,
        tanh_dtype=jnp.bfloat16 if use_bf16 else jnp.float32,
        row_chunk=64, col_chunk=256)

    def _nbytes(shape, dtype):
        return int(np.prod(shape)) * jnp.dtype(dtype).itemsize

    cost = pl.CostEstimate(
        flops=int(2 * B * (n_p * Dv * Dq_eff * Lq        # sq^T (recomputed/tile)
                           + Lp_pad * Dp * Dv            # sp projection
                           + Lp_pad * Lq * Dv            # score mul/add
                           + Lp_pad * Lq * Dq_eff)),     # final matmul
        transcendentals=int(B * Lp_pad * Lq * (Dv + 1)),  # tanh + exp
        bytes_accessed=int(_nbytes((B, Lq, Dq_eff), mm_dtype)
                           + _nbytes((B, Dq_eff, Lq), f32)
                           + _nbytes((B, Lp_pad, Dp), f32)
                           + _nbytes((Dv, Dq_eff), f32)
                           + _nbytes((Dp, Dv), f32)
                           + _nbytes((1, Dv), f32)
                           + _nbytes((B, Lp_pad, Dq_eff), hq.dtype)))

    out_p = pl.pallas_call(
        kernel,
        out_shape=jax.ShapeDtypeStruct((B, Lp_pad, Dq_eff), hq.dtype),
        grid_spec=pltpu.PrefetchScalarGridSpec(
            num_scalar_prefetch=0,
            grid=(B, n_p),
            in_specs=[
                # TODO(synk): pipeline_mode=pl.Buffered(1) on the grid-invariant
                # operands (hq, hq^T, W1^T, W2) would halve their VMEM on v7x.
                pl.BlockSpec((1, Lq, Dq_eff), lambda b, p: (b, 0, 0)),   # hq
                pl.BlockSpec((1, Dq_eff, Lq), lambda b, p: (b, 0, 0)),   # hq^T
                pl.BlockSpec((1, tp, Dp), lambda b, p: (b, p, 0)),       # hp tile
                pl.BlockSpec((Dv, Dq_eff), lambda b, p: (0, 0)),         # W1^T
                pl.BlockSpec((Dp, Dv), lambda b, p: (0, 0)),             # W2
                pl.BlockSpec(memory_space=pltpu.MemorySpace.SMEM),       # v scalars
            ],
            out_specs=pl.BlockSpec((1, tp, Dq_eff), lambda b, p: (b, p, 0)),
            scratch_shapes=[pltpu.VMEM((tp, Lq), jnp.float32)],          # score tile
        ),
        compiler_params=pltpu.CompilerParams(
            # No cross-step accumulation -> both axes are megacore-shardable.
            dimension_semantics=("parallel", "parallel"),
            vmem_limit_bytes=int(vmem_cap * 3 // 4),
        ),
        cost_estimate=cost,
    )(hq_mm, hq_t, hp_p, w1_t, w2_f, v_f)

    if Lp_pad != Lp or Dq_eff != Dq:
        out_p = out_p[:, :Lp, :Dq]
    return out_p


def concat_attention_ref(hq, hp, w1, w2, v):
    sq = jnp.einsum('bqi,iv->bqv', hq, w1)
    sp = jnp.einsum('bpj,jv->bpv', hp, w2)
    h_plus = jnp.tanh(sp[:, :, None, :] + sq[:, None, :, :])   # (B, Lp, Lq, Dv)
    s = jnp.einsum('bpqv,v->bpq', h_plus, v[0])
    a = jax.nn.softmax(s, axis=2)
    return jnp.einsum('bpq,bqd->bpd', a, hq)


if __name__ == "__main__":
    # Small shapes consistent with the module's forward:
    #   hq: (B, Lq, q_size), hp: (B, Lp, p_size)
    B, Lq, Lp = 2, 8, 8
    q_size, p_size, v_size = 16, 24, 32

    key = jax.random.PRNGKey(0)
    k_hq, k_hp, k_w1, k_w2, k_v = jax.random.split(key, 5)

    hq = jax.random.normal(k_hq, (B, Lq, q_size), dtype=jnp.float32)
    hp = jax.random.normal(k_hp, (B, Lp, p_size), dtype=jnp.float32)

    # Deterministic parameter init (stored as (in, out), i.e. PyTorch weight.T).
    w1 = 0.1 * jax.random.normal(k_w1, (q_size, v_size), dtype=jnp.float32)
    w2 = 0.1 * jax.random.normal(k_w2, (p_size, v_size), dtype=jnp.float32)
    v = 0.1 * jax.random.normal(k_v, (1, v_size), dtype=jnp.float32)

    use_bf16 = _default_use_bf16()
    out = jax.block_until_ready(
        concat_attention(hq, hp, w1, w2, v, use_bf16=use_bf16))
    ref = concat_attention_ref(hq, hp, w1, w2, v)

    # f32 path (v5e/other): only the approx-reciprocal (+Newton) normalization
    # differs from the reference.  bf16 path (v6e/v7x): tanh operands, tanh and
    # the final-matmul operands are bf16, so tolerance is relaxed accordingly.
    tol = 2e-2 if use_bf16 else 1e-4
    np.testing.assert_allclose(np.asarray(out), np.asarray(ref),
                               atol=tol, rtol=tol)

    print("KERNEL_OK")
</pallas_src>

<mosaic_0001>
module attributes {stable_mosaic.version = 11 : i64} {
  func.func @_concat_attn_kernel(%arg0: i32, %arg1: i32, %arg2: memref<1x8x16xf32, #tpu.memory_space<vmem>>, %arg3: memref<1x16x8xf32, #tpu.memory_space<vmem>>, %arg4: memref<1x8x24xf32, #tpu.memory_space<vmem>>, %arg5: memref<32x16xf32, #tpu.memory_space<vmem>>, %arg6: memref<24x32xf32, #tpu.memory_space<vmem>>, %arg7: memref<1x32xf32, #tpu.memory_space<smem>>, %arg8: memref<1x8x16xf32, #tpu.memory_space<vmem>>, %arg9: memref<8x8xf32, #tpu.memory_space<vmem>>) attributes {dimension_semantics = [#tpu.dimension_semantics<parallel>, #tpu.dimension_semantics<parallel>], iteration_bounds = array<i64: 2, 1>, scalar_prefetch = 0 : i64, scratch_operands = 1 : i64, tpu.core_type = #tpu.core_type<tc>, window_params = [{transform_indices = @transform_0, window_bounds = array<i64: 1, 8, 16>}, {transform_indices = @transform_1, window_bounds = array<i64: 1, 16, 8>}, {transform_indices = @transform_2, window_bounds = array<i64: 1, 8, 24>}, {pipeline_mode = #tpu.pipeline_mode<synchronous>, transform_indices = @transform_3, window_bounds = array<i64: 32, 16>}, {pipeline_mode = #tpu.pipeline_mode<synchronous>, transform_indices = @transform_4, window_bounds = array<i64: 24, 32>}, {transform_indices = @transform_5, window_bounds = array<i64: 1, 32>}, {transform_indices = @transform_6, window_bounds = array<i64: 1, 8, 16>}]} {
    %c0 = arith.constant 0 : index
    %c0_0 = arith.constant 0 : index
    %c0_1 = arith.constant 0 : index
    %0 = vector.load %arg2[%c0, %c0_0, %c0_1] : memref<1x8x16xf32, #tpu.memory_space<vmem>>, vector<1x8x16xf32>
    %1 = vector.shape_cast %0 : vector<1x8x16xf32> to vector<8x16xf32>
    %c0_2 = arith.constant 0 : index
    %c0_3 = arith.constant 0 : index
    %c0_4 = arith.constant 0 : index
    %2 = vector.load %arg3[%c0_2, %c0_3, %c0_4] : memref<1x16x8xf32, #tpu.memory_space<vmem>>, vector<1x16x8xf32>
    %3 = vector.shape_cast %2 : vector<1x16x8xf32> to vector<16x8xf32>
    %c0_5 = arith.constant 0 : index
    %c0_6 = arith.constant 0 : index
    %c0_7 = arith.constant 0 : index
    %4 = vector.load %arg4[%c0_5, %c0_6, %c0_7] : memref<1x8x24xf32, #tpu.memory_space<vmem>>, vector<1x8x24xf32>
    %5 = vector.shape_cast %4 : vector<1x8x24xf32> to vector<8x24xf32>
    %c0_8 = arith.constant 0 : index
    %c0_9 = arith.constant 0 : index
    %6 = vector.load %arg5[%c0_8, %c0_9] : memref<32x16xf32, #tpu.memory_space<vmem>>, vector<32x16xf32>
    %c0_10 = arith.constant 0 : index
    %c0_11 = arith.constant 0 : index
    %7 = vector.load %arg6[%c0_10, %c0_11] : memref<24x32xf32, #tpu.memory_space<vmem>>, vector<24x32xf32>
    %cst = arith.constant dense<0.000000e+00> : vector<32x8xf32>
    %8 = tpu.matmul %6, %3, %cst {dimension_numbers = #tpu.dot_dimension_numbers<[1], [0], [0], [1], [0, 0, 1, 1], [], []>} : vector<32x16xf32>, vector<16x8xf32>, vector<32x8xf32> -> vector<32x8xf32>
    %cst_12 = arith.constant dense<0.000000e+00> : vector<8x32xf32>
    %9 = tpu.matmul %5, %7, %cst_12 {dimension_numbers = #tpu.dot_dimension_numbers<[1], [0], [0], [1], [0, 0, 1, 1], [], []>} : vector<8x24xf32>, vector<24x32xf32>, vector<8x32xf32> -> vector<8x32xf32>
    %c0_13 = arith.constant 0 : index
    %c0_14 = arith.constant 0 : index
    %10 = memref.load %arg7[%c0_13, %c0_14] : memref<1x32xf32, #tpu.memory_space<smem>>
    %c0_15 = arith.constant 0 : index
    %c1 = arith.constant 1 : index
    %11 = memref.load %arg7[%c0_15, %c1] : memref<1x32xf32, #tpu.memory_space<smem>>
    %c0_16 = arith.constant 0 : index
    %c2 = arith.constant 2 : index
    %12 = memref.load %arg7[%c0_16, %c2] : memref<1x32xf32, #tpu.memory_space<smem>>
    %c0_17 = arith.constant 0 : index
    %c3 = arith.constant 3 : index
    %13 = memref.load %arg7[%c0_17, %c3] : memref<1x32xf32, #tpu.memory_space<smem>>
    %c0_18 = arith.constant 0 : index
    %c4 = arith.constant 4 : index
    %14 = memref.load %arg7[%c0_18, %c4] : memref<1x32xf32, #tpu.memory_space<smem>>
    %c0_19 = arith.constant 0 : index
    %c5 = arith.constant 5 : index
    %15 = memref.load %arg7[%c0_19, %c5] : memref<1x32xf32, #tpu.memory_space<smem>>
    %c0_20 = arith.constant 0 : index
    %c6 = arith.constant 6 : index
    %16 = memref.load %arg7[%c0_20, %c6] : memref<1x32xf32, #tpu.memory_space<smem>>
    %c0_21 = arith.constant 0 : index
    %c7 = arith.constant 7 : index
    %17 = memref.load %arg7[%c0_21, %c7] : memref<1x32xf32, #tpu.memory_space<smem>>
    %c0_22 = arith.constant 0 : index
    %c8 = arith.constant 8 : index
    %18 = memref.load %arg7[%c0_22, %c8] : memref<1x32xf32, #tpu.memory_space<smem>>
    %c0_23 = arith.constant 0 : index
    %c9 = arith.constant 9 : index
    %19 = memref.load %arg7[%c0_23, %c9] : memref<1x32xf32, #tpu.memory_space<smem>>
    %c0_24 = arith.constant 0 : index
    %c10 = arith.constant 10 : index
    %20 = memref.load %arg7[%c0_24, %c10] : memref<1x32xf32, #tpu.memory_space<smem>>
    %c0_25 = arith.constant 0 : index
    %c11 = arith.constant 11 : index
    %21 = memref.load %arg7[%c0_25, %c11] : memref<1x32xf32, #tpu.memory_space<smem>>
    %c0_26 = arith.constant 0 : index
    %c12 = arith.constant 12 : index
    %22 = memref.load %arg7[%c0_26, %c12] : memref<1x32xf32, #tpu.memory_space<smem>>
    %c0_27 = arith.constant 0 : index
    %c13 = arith.constant 13 : index
    %23 = memref.load %arg7[%c0_27, %c13] : memref<1x32xf32, #tpu.memory_space<smem>>
    %c0_28 = arith.constant 0 : index
    %c14 = arith.constant 14 : index
    %24 = memref.load %arg7[%c0_28, %c14] : memref<1x32xf32, #tpu.memory_space<smem>>
    %c0_29 = arith.constant 0 : index
    %c15 = arith.constant 15 : index
    %25 = memref.load %arg7[%c0_29, %c15] : memref<1x32xf32, #tpu.memory_space<smem>>
    %c0_30 = arith.constant 0 : index
    %c16 = arith.constant 16 : index
    %26 = memref.load %arg7[%c0_30, %c16] : memref<1x32xf32, #tpu.memory_space<smem>>
    %c0_31 = arith.constant 0 : index
    %c17 = arith.constant 17 : index
    %27 = memref.load %arg7[%c0_31, %c17] : memref<1x32xf32, #tpu.memory_space<smem>>
    %c0_32 = arith.constant 0 : index
    %c18 = arith.constant 18 : index
    %28 = memref.load %arg7[%c0_32, %c18] : memref<1x32xf32, #tpu.memory_space<smem>>
    %c0_33 = arith.constant 0 : index
    %c19 = arith.constant 19 : index
    %29 = memref.load %arg7[%c0_33, %c19] : memref<1x32xf32, #tpu.memory_space<smem>>
    %c0_34 = arith.constant 0 : index
    %c20 = arith.constant 20 : index
    %30 = memref.load %arg7[%c0_34, %c20] : memref<1x32xf32, #tpu.memory_space<smem>>
    %c0_35 = arith.constant 0 : index
    %c21 = arith.constant 21 : index
    %31 = memref.load %arg7[%c0_35, %c21] : memref<1x32xf32, #tpu.memory_space<smem>>
    %c0_36 = arith.constant 0 : index
    %c22 = arith.constant 22 : index
    %32 = memref.load %arg7[%c0_36, %c22] : memref<1x32xf32, #tpu.memory_space<smem>>
    %c0_37 = arith.constant 0 : index
    %c23 = arith.constant 23 : index
    %33 = memref.load %arg7[%c0_37, %c23] : memref<1x32xf32, #tpu.memory_space<smem>>
    %c0_38 = arith.constant 0 : index
    %c24 = arith.constant 24 : index
    %34 = memref.load %arg7[%c0_38, %c24] : memref<1x32xf32, #tpu.memory_space<smem>>
    %c0_39 = arith.constant 0 : index
    %c25 = arith.constant 25 : index
    %35 = memref.load %arg7[%c0_39, %c25] : memref<1x32xf32, #tpu.memory_space<smem>>
    %c0_40 = arith.constant 0 : index
    %c26 = arith.constant 26 : index
    %36 = memref.load %arg7[%c0_40, %c26] : memref<1x32xf32, #tpu.memory_space<smem>>
    %c0_41 = arith.constant 0 : index
    %c27 = arith.constant 27 : index
    %37 = memref.load %arg7[%c0_41, %c27] : memref<1x32xf32, #tpu.memory_space<smem>>
    %c0_42 = arith.constant 0 : index
    %c28 = arith.constant 28 : index
    %38 = memref.load %arg7[%c0_42, %c28] : memref<1x32xf32, #tpu.memory_space<smem>>
    %c0_43 = arith.constant 0 : index
    %c29 = arith.constant 29 : index
    %39 = memref.load %arg7[%c0_43, %c29] : memref<1x32xf32, #tpu.memory_space<smem>>
    %c0_44 = arith.constant 0 : index
    %c30 = arith.constant 30 : index
    %40 = memref.load %arg7[%c0_44, %c30] : memref<1x32xf32, #tpu.memory_space<smem>>
    %c0_45 = arith.constant 0 : index
    %c31 = arith.constant 31 : index
    %41 = memref.load %arg7[%c0_45, %c31] : memref<1x32xf32, #tpu.memory_space<smem>>
    %cst_46 = arith.constant 0.000000e+00 : f32
    %42 = vector.broadcast %cst_46 : f32 to vector<8x8xf32>
    %43 = vector.extract_strided_slice %9 {offsets = [0, 0], sizes = [8, 1], strides = [1, 1]} : vector<8x32xf32> to vector<8x1xf32>
    %44 = vector.extract_strided_slice %8 {offsets = [0, 0], sizes = [1, 8], strides = [1, 1]} : vector<32x8xf32> to vector<1x8xf32>
    %45 = vector.broadcast %43 : vector<8x1xf32> to vector<8x8xf32>
    %46 = vector.broadcast %44 : vector<1x8xf32> to vector<8x8xf32>
    %47 = arith.addf %45, %46 : vector<8x8xf32>
    %48 = math.tanh %47 : vector<8x8xf32>
    %49 = vector.broadcast %10 : f32 to vector<8x8xf32>
    %50 = arith.mulf %49, %48 : vector<8x8xf32>
    %51 = arith.addf %42, %50 : vector<8x8xf32>
    %52 = vector.extract_strided_slice %9 {offsets = [0, 1], sizes = [8, 1], strides = [1, 1]} : vector<8x32xf32> to vector<8x1xf32>
    %53 = vector.extract_strided_slice %8 {offsets = [1, 0], sizes = [1, 8], strides = [1, 1]} : vector<32x8xf32> to vector<1x8xf32>
    %54 = vector.broadcast %52 : vector<8x1xf32> to vector<8x8xf32>
    %55 = vector.broadcast %53 : vector<1x8xf32> to vector<8x8xf32>
    %56 = arith.addf %54, %55 : vector<8x8xf32>
    %57 = math.tanh %56 : vector<8x8xf32>
    %58 = vector.broadcast %11 : f32 to vector<8x8xf32>
    %59 = arith.mulf %58, %57 : vector<8x8xf32>
    %60 = arith.addf %51, %59 : vector<8x8xf32>
    %61 = vector.extract_strided_slice %9 {offsets = [0, 2], sizes = [8, 1], strides = [1, 1]} : vector<8x32xf32> to vector<8x1xf32>
    %62 = vector.extract_strided_slice %8 {offsets = [2, 0], sizes = [1, 8], strides = [1, 1]} : vector<32x8xf32> to vector<1x8xf32>
    %63 = vector.broadcast %61 : vector<8x1xf32> to vector<8x8xf32>
    %64 = vector.broadcast %62 : vector<1x8xf32> to vector<8x8xf32>
    %65 = arith.addf %63, %64 : vector<8x8xf32>
    %66 = math.tanh %65 : vector<8x8xf32>
    %67 = vector.broadcast %12 : f32 to vector<8x8xf32>
    %68 = arith.mulf %67, %66 : vector<8x8xf32>
    %69 = arith.addf %60, %68 : vector<8x8xf32>
    %70 = vector.extract_strided_slice %9 {offsets = [0, 3], sizes = [8, 1], strides = [1, 1]} : vector<8x32xf32> to vector<8x1xf32>
    %71 = vector.extract_strided_slice %8 {offsets = [3, 0], sizes = [1, 8], strides = [1, 1]} : vector<32x8xf32> to vector<1x8xf32>
    %72 = vector.broadcast %70 : vector<8x1xf32> to vector<8x8xf32>
    %73 = vector.broadcast %71 : vector<1x8xf32> to vector<8x8xf32>
    %74 = arith.addf %72, %73 : vector<8x8xf32>
    %75 = math.tanh %74 : vector<8x8xf32>
    %76 = vector.broadcast %13 : f32 to vector<8x8xf32>
    %77 = arith.mulf %76, %75 : vector<8x8xf32>
    %78 = arith.addf %69, %77 : vector<8x8xf32>
    %79 = vector.extract_strided_slice %9 {offsets = [0, 4], sizes = [8, 1], strides = [1, 1]} : vector<8x32xf32> to vector<8x1xf32>
    %80 = vector.extract_strided_slice %8 {offsets = [4, 0], sizes = [1, 8], strides = [1, 1]} : vector<32x8xf32> to vector<1x8xf32>
    %81 = vector.broadcast %79 : vector<8x1xf32> to vector<8x8xf32>
    %82 = vector.broadcast %80 : vector<1x8xf32> to vector<8x8xf32>
    %83 = arith.addf %81, %82 : vector<8x8xf32>
    %84 = math.tanh %83 : vector<8x8xf32>
    %85 = vector.broadcast %14 : f32 to vector<8x8xf32>
    %86 = arith.mulf %85, %84 : vector<8x8xf32>
    %87 = arith.addf %78, %86 : vector<8x8xf32>
    %88 = vector.extract_strided_slice %9 {offsets = [0, 5], sizes = [8, 1], strides = [1, 1]} : vector<8x32xf32> to vector<8x1xf32>
    %89 = vector.extract_strided_slice %8 {offsets = [5, 0], sizes = [1, 8], strides = [1, 1]} : vector<32x8xf32> to vector<1x8xf32>
    %90 = vector.broadcast %88 : vector<8x1xf32> to vector<8x8xf32>
    %91 = vector.broadcast %89 : vector<1x8xf32> to vector<8x8xf32>
    %92 = arith.addf %90, %91 : vector<8x8xf32>
    %93 = math.tanh %92 : vector<8x8xf32>
    %94 = vector.broadcast %15 : f32 to vector<8x8xf32>
    %95 = arith.mulf %94, %93 : vector<8x8xf32>
    %96 = arith.addf %87, %95 : vector<8x8xf32>
    %97 = vector.extract_strided_slice %9 {offsets = [0, 6], sizes = [8, 1], strides = [1, 1]} : vector<8x32xf32> to vector<8x1xf32>
    %98 = vector.extract_strided_slice %8 {offsets = [6, 0], sizes = [1, 8], strides = [1, 1]} : vector<32x8xf32> to vector<1x8xf32>
    %99 = vector.broadcast %97 : vector<8x1xf32> to vector<8x8xf32>
    %100 = vector.broadcast %98 : vector<1x8xf32> to vector<8x8xf32>
    %101 = arith.addf %99, %100 : vector<8x8xf32>
    %102 = math.tanh %101 : vector<8x8xf32>
    %103 = vector.broadcast %16 : f32 to vector<8x8xf32>
    %104 = arith.mulf %103, %102 : vector<8x8xf32>
    %105 = arith.addf %96, %104 : vector<8x8xf32>
    %106 = vector.extract_strided_slice %9 {offsets = [0, 7], sizes = [8, 1], strides = [1, 1]} : vector<8x32xf32> to vector<8x1xf32>
    %107 = vector.extract_strided_slice %8 {offsets = [7, 0], sizes = [1, 8], strides = [1, 1]} : vector<32x8xf32> to vector<1x8xf32>
    %108 = vector.broadcast %106 : vector<8x1xf32> to vector<8x8xf32>
    %109 = vector.broadcast %107 : vector<1x8xf32> to vector<8x8xf32>
    %110 = arith.addf %108, %109 : vector<8x8xf32>
    %111 = math.tanh %110 : vector<8x8xf32>
    %112 = vector.broadcast %17 : f32 to vector<8x8xf32>
    %113 = arith.mulf %112, %111 : vector<8x8xf32>
    %114 = arith.addf %105, %113 : vector<8x8xf32>
    %115 = vector.extract_strided_slice %9 {offsets = [0, 8], sizes = [8, 1], strides = [1, 1]} : vector<8x32xf32> to vector<8x1xf32>
    %116 = vector.extract_strided_slice %8 {offsets = [8, 0], sizes = [1, 8], strides = [1, 1]} : vector<32x8xf32> to vector<1x8xf32>
    %117 = vector.broadcast %115 : vector<8x1xf32> to vector<8x8xf32>
    %118 = vector.broadcast %116 : vector<1x8xf32> to vector<8x8xf32>
    %119 = arith.addf %117, %118 : vector<8x8xf32>
    %120 = math.tanh %119 : vector<8x8xf32>
    %121 = vector.broadcast %18 : f32 to vector<8x8xf32>
    %122 = arith.mulf %121, %120 : vector<8x8xf32>
    %123 = arith.addf %114, %122 : vector<8x8xf32>
    %124 = vector.extract_strided_slice %9 {offsets = [0, 9], sizes = [8, 1], strides = [1, 1]} : vector<8x32xf32> to vector<8x1xf32>
    %125 = vector.extract_strided_slice %8 {offsets = [9, 0], sizes = [1, 8], strides = [1, 1]} : vector<32x8xf32> to vector<1x8xf32>
    %126 = vector.broadcast %124 : vector<8x1xf32> to vector<8x8xf32>
    %127 = vector.broadcast %125 : vector<1x8xf32> to vector<8x8xf32>
    %128 = arith.addf %126, %127 : vector<8x8xf32>
    %129 = math.tanh %128 : vector<8x8xf32>
    %130 = vector.broadcast %19 : f32 to vector<8x8xf32>
    %131 = arith.mulf %130, %129 : vector<8x8xf32>
    %132 = arith.addf %123, %131 : vector<8x8xf32>
    %133 = vector.extract_strided_slice %9 {offsets = [0, 10], sizes = [8, 1], strides = [1, 1]} : vector<8x32xf32> to vector<8x1xf32>
    %134 = vector.extract_strided_slice %8 {offsets = [10, 0], sizes = [1, 8], strides = [1, 1]} : vector<32x8xf32> to vector<1x8xf32>
    %135 = vector.broadcast %133 : vector<8x1xf32> to vector<8x8xf32>
    %136 = vector.broadcast %134 : vector<1x8xf32> to vector<8x8xf32>
    %137 = arith.addf %135, %136 : vector<8x8xf32>
    %138 = math.tanh %137 : vector<8x8xf32>
    %139 = vector.broadcast %20 : f32 to vector<8x8xf32>
    %140 = arith.mulf %139, %138 : vector<8x8xf32>
    %141 = arith.addf %132, %140 : vector<8x8xf32>
    %142 = vector.extract_strided_slice %9 {offsets = [0, 11], sizes = [8, 1], strides = [1, 1]} : vector<8x32xf32> to vector<8x1xf32>
    %143 = vector.extract_strided_slice %8 {offsets = [11, 0], sizes = [1, 8], strides = [1, 1]} : vector<32x8xf32> to vector<1x8xf32>
    %144 = vector.broadcast %142 : vector<8x1xf32> to vector<8x8xf32>
    %145 = vector.broadcast %143 : vector<1x8xf32> to vector<8x8xf32>
    %146 = arith.addf %144, %145 : vector<8x8xf32>
    %147 = math.tanh %146 : vector<8x8xf32>
    %148 = vector.broadcast %21 : f32 to vector<8x8xf32>
    %149 = arith.mulf %148, %147 : vector<8x8xf32>
    %150 = arith.addf %141, %149 : vector<8x8xf32>
    %151 = vector.extract_strided_slice %9 {offsets = [0, 12], sizes = [8, 1], strides = [1, 1]} : vector<8x32xf32> to vector<8x1xf32>
    %152 = vector.extract_strided_slice %8 {offsets = [12, 0], sizes = [1, 8], strides = [1, 1]} : vector<32x8xf32> to vector<1x8xf32>
    %153 = vector.broadcast %151 : vector<8x1xf32> to vector<8x8xf32>
    %154 = vector.broadcast %152 : vector<1x8xf32> to vector<8x8xf32>
    %155 = arith.addf %153, %154 : vector<8x8xf32>
    %156 = math.tanh %155 : vector<8x8xf32>
    %157 = vector.broadcast %22 : f32 to vector<8x8xf32>
    %158 = arith.mulf %157, %156 : vector<8x8xf32>
    %159 = arith.addf %150, %158 : vector<8x8xf32>
    %160 = vector.extract_strided_slice %9 {offsets = [0, 13], sizes = [8, 1], strides = [1, 1]} : vector<8x32xf32> to vector<8x1xf32>
    %161 = vector.extract_strided_slice %8 {offsets = [13, 0], sizes = [1, 8], strides = [1, 1]} : vector<32x8xf32> to vector<1x8xf32>
    %162 = vector.broadcast %160 : vector<8x1xf32> to vector<8x8xf32>
    %163 = vector.broadcast %161 : vector<1x8xf32> to vector<8x8xf32>
    %164 = arith.addf %162, %163 : vector<8x8xf32>
    %165 = math.tanh %164 : vector<8x8xf32>
    %166 = vector.broadcast %23 : f32 to vector<8x8xf32>
    %167 = arith.mulf %166, %165 : vector<8x8xf32>
    %168 = arith.addf %159, %167 : vector<8x8xf32>
    %169 = vector.extract_strided_slice %9 {offsets = [0, 14], sizes = [8, 1], strides = [1, 1]} : vector<8x32xf32> to vector<8x1xf32>
    %170 = vector.extract_strided_slice %8 {offsets = [14, 0], sizes = [1, 8], strides = [1, 1]} : vector<32x8xf32> to vector<1x8xf32>
    %171 = vector.broadcast %169 : vector<8x1xf32> to vector<8x8xf32>
    %172 = vector.broadcast %170 : vector<1x8xf32> to vector<8x8xf32>
    %173 = arith.addf %171, %172 : vector<8x8xf32>
    %174 = math.tanh %173 : vector<8x8xf32>
    %175 = vector.broadcast %24 : f32 to vector<8x8xf32>
    %176 = arith.mulf %175, %174 : vector<8x8xf32>
    %177 = arith.addf %168, %176 : vector<8x8xf32>
    %178 = vector.extract_strided_slice %9 {offsets = [0, 15], sizes = [8, 1], strides = [1, 1]} : vector<8x32xf32> to vector<8x1xf32>
    %179 = vector.extract_strided_slice %8 {offsets = [15, 0], sizes = [1, 8], strides = [1, 1]} : vector<32x8xf32> to vector<1x8xf32>
    %180 = vector.broadcast %178 : vector<8x1xf32> to vector<8x8xf32>
    %181 = vector.broadcast %179 : vector<1x8xf32> to vector<8x8xf32>
    %182 = arith.addf %180, %181 : vector<8x8xf32>
    %183 = math.tanh %182 : vector<8x8xf32>
    %184 = vector.broadcast %25 : f32 to vector<8x8xf32>
    %185 = arith.mulf %184, %183 : vector<8x8xf32>
    %186 = arith.addf %177, %185 : vector<8x8xf32>
    %187 = vector.extract_strided_slice %9 {offsets = [0, 16], sizes = [8, 1], strides = [1, 1]} : vector<8x32xf32> to vector<8x1xf32>
    %188 = vector.extract_strided_slice %8 {offsets = [16, 0], sizes = [1, 8], strides = [1, 1]} : vector<32x8xf32> to vector<1x8xf32>
    %189 = vector.broadcast %187 : vector<8x1xf32> to vector<8x8xf32>
    %190 = vector.broadcast %188 : vector<1x8xf32> to vector<8x8xf32>
    %191 = arith.addf %189, %190 : vector<8x8xf32>
    %192 = math.tanh %191 : vector<8x8xf32>
    %193 = vector.broadcast %26 : f32 to vector<8x8xf32>
    %194 = arith.mulf %193, %192 : vector<8x8xf32>
    %195 = arith.addf %186, %194 : vector<8x8xf32>
    %196 = vector.extract_strided_slice %9 {offsets = [0, 17], sizes = [8, 1], strides = [1, 1]} : vector<8x32xf32> to vector<8x1xf32>
    %197 = vector.extract_strided_slice %8 {offsets = [17, 0], sizes = [1, 8], strides = [1, 1]} : vector<32x8xf32> to vector<1x8xf32>
    %198 = vector.broadcast %196 : vector<8x1xf32> to vector<8x8xf32>
    %199 = vector.broadcast %197 : vector<1x8xf32> to vector<8x8xf32>
    %200 = arith.addf %198, %199 : vector<8x8xf32>
    %201 = math.tanh %200 : vector<8x8xf32>
    %202 = vector.broadcast %27 : f32 to vector<8x8xf32>
    %203 = arith.mulf %202, %201 : vector<8x8xf32>
    %204 = arith.addf %195, %203 : vector<8x8xf32>
    %205 = vector.extract_strided_slice %9 {offsets = [0, 18], sizes = [8, 1], strides = [1, 1]} : vector<8x32xf32> to vector<8x1xf32>
    %206 = vector.extract_strided_slice %8 {offsets = [18, 0], sizes = [1, 8], strides = [1, 1]} : vector<32x8xf32> to vector<1x8xf32>
    %207 = vector.broadcast %205 : vector<8x1xf32> to vector<8x8xf32>
    %208 = vector.broadcast %206 : vector<1x8xf32> to vector<8x8xf32>
    %209 = arith.addf %207, %208 : vector<8x8xf32>
    %210 = math.tanh %209 : vector<8x8xf32>
    %211 = vector.broadcast %28 : f32 to vector<8x8xf32>
    %212 = arith.mulf %211, %210 : vector<8x8xf32>
    %213 = arith.addf %204, %212 : vector<8x8xf32>
    %214 = vector.extract_strided_slice %9 {offsets = [0, 19], sizes = [8, 1], strides = [1, 1]} : vector<8x32xf32> to vector<8x1xf32>
    %215 = vector.extract_strided_slice %8 {offsets = [19, 0], sizes = [1, 8], strides = [1, 1]} : vector<32x8xf32> to vector<1x8xf32>
    %216 = vector.broadcast %214 : vector<8x1xf32> to vector<8x8xf32>
    %217 = vector.broadcast %215 : vector<1x8xf32> to vector<8x8xf32>
    %218 = arith.addf %216, %217 : vector<8x8xf32>
    %219 = math.tanh %218 : vector<8x8xf32>
    %220 = vector.broadcast %29 : f32 to vector<8x8xf32>
    %221 = arith.mulf %220, %219 : vector<8x8xf32>
    %222 = arith.addf %213, %221 : vector<8x8xf32>
    %223 = vector.extract_strided_slice %9 {offsets = [0, 20], sizes = [8, 1], strides = [1, 1]} : vector<8x32xf32> to vector<8x1xf32>
    %224 = vector.extract_strided_slice %8 {offsets = [20, 0], sizes = [1, 8], strides = [1, 1]} : vector<32x8xf32> to vector<1x8xf32>
    %225 = vector.broadcast %223 : vector<8x1xf32> to vector<8x8xf32>
    %226 = vector.broadcast %224 : vector<1x8xf32> to vector<8x8xf32>
    %227 = arith.addf %225, %226 : vector<8x8xf32>
    %228 = math.tanh %227 : vector<8x8xf32>
    %229 = vector.broadcast %30 : f32 to vector<8x8xf32>
    %230 = arith.mulf %229, %228 : vector<8x8xf32>
    %231 = arith.addf %222, %230 : vector<8x8xf32>
    %232 = vector.extract_strided_slice %9 {offsets = [0, 21], sizes = [8, 1], strides = [1, 1]} : vector<8x32xf32> to vector<8x1xf32>
    %233 = vector.extract_strided_slice %8 {offsets = [21, 0], sizes = [1, 8], strides = [1, 1]} : vector<32x8xf32> to vector<1x8xf32>
    %234 = vector.broadcast %232 : vector<8x1xf32> to vector<8x8xf32>
    %235 = vector.broadcast %233 : vector<1x8xf32> to vector<8x8xf32>
    %236 = arith.addf %234, %235 : vector<8x8xf32>
    %237 = math.tanh %236 : vector<8x8xf32>
    %238 = vector.broadcast %31 : f32 to vector<8x8xf32>
    %239 = arith.mulf %238, %237 : vector<8x8xf32>
    %240 = arith.addf %231, %239 : vector<8x8xf32>
    %241 = vector.extract_strided_slice %9 {offsets = [0, 22], sizes = [8, 1], strides = [1, 1]} : vector<8x32xf32> to vector<8x1xf32>
    %242 = vector.extract_strided_slice %8 {offsets = [22, 0], sizes = [1, 8], strides = [1, 1]} : vector<32x8xf32> to vector<1x8xf32>
    %243 = vector.broadcast %241 : vector<8x1xf32> to vector<8x8xf32>
    %244 = vector.broadcast %242 : vector<1x8xf32> to vector<8x8xf32>
    %245 = arith.addf %243, %244 : vector<8x8xf32>
    %246 = math.tanh %245 : vector<8x8xf32>
    %247 = vector.broadcast %32 : f32 to vector<8x8xf32>
    %248 = arith.mulf %247, %246 : vector<8x8xf32>
    %249 = arith.addf %240, %248 : vector<8x8xf32>
    %250 = vector.extract_strided_slice %9 {offsets = [0, 23], sizes = [8, 1], strides = [1, 1]} : vector<8x32xf32> to vector<8x1xf32>
    %251 = vector.extract_strided_slice %8 {offsets = [23, 0], sizes = [1, 8], strides = [1, 1]} : vector<32x8xf32> to vector<1x8xf32>
    %252 = vector.broadcast %250 : vector<8x1xf32> to vector<8x8xf32>
    %253 = vector.broadcast %251 : vector<1x8xf32> to vector<8x8xf32>
    %254 = arith.addf %252, %253 : vector<8x8xf32>
    %255 = math.tanh %254 : vector<8x8xf32>
    %256 = vector.broadcast %33 : f32 to vector<8x8xf32>
    %257 = arith.mulf %256, %255 : vector<8x8xf32>
    %258 = arith.addf %249, %257 : vector<8x8xf32>
    %259 = vector.extract_strided_slice %9 {offsets = [0, 24], sizes = [8, 1], strides = [1, 1]} : vector<8x32xf32> to vector<8x1xf32>
    %260 = vector.extract_strided_slice %8 {offsets = [24, 0], sizes = [1, 8], strides = [1, 1]} : vector<32x8xf32> to vector<1x8xf32>
    %261 = vector.broadcast %259 : vector<8x1xf32> to vector<8x8xf32>
    %262 = vector.broadcast %260 : vector<1x8xf32> to vector<8x8xf32>
    %263 = arith.addf %261, %262 : vector<8x8xf32>
    %264 = math.tanh %263 : vector<8x8xf32>
    %265 = vector.broadcast %34 : f32 to vector<8x8xf32>
    %266 = arith.mulf %265, %264 : vector<8x8xf32>
    %267 = arith.addf %258, %266 : vector<8x8xf32>
    %268 = vector.extract_strided_slice %9 {offsets = [0, 25], sizes = [8, 1], strides = [1, 1]} : vector<8x32xf32> to vector<8x1xf32>
    %269 = vector.extract_strided_slice %8 {offsets = [25, 0], sizes = [1, 8], strides = [1, 1]} : vector<32x8xf32> to vector<1x8xf32>
    %270 = vector.broadcast %268 : vector<8x1xf32> to vector<8x8xf32>
    %271 = vector.broadcast %269 : vector<1x8xf32> to vector<8x8xf32>
    %272 = arith.addf %270, %271 : vector<8x8xf32>
    %273 = math.tanh %272 : vector<8x8xf32>
    %274 = vector.broadcast %35 : f32 to vector<8x8xf32>
    %275 = arith.mulf %274, %273 : vector<8x8xf32>
    %276 = arith.addf %267, %275 : vector<8x8xf32>
    %277 = vector.extract_strided_slice %9 {offsets = [0, 26], sizes = [8, 1], strides = [1, 1]} : vector<8x32xf32> to vector<8x1xf32>
    %278 = vector.extract_strided_slice %8 {offsets = [26, 0], sizes = [1, 8], strides = [1, 1]} : vector<32x8xf32> to vector<1x8xf32>
    %279 = vector.broadcast %277 : vector<8x1xf32> to vector<8x8xf32>
    %280 = vector.broadcast %278 : vector<1x8xf32> to vector<8x8xf32>
    %281 = arith.addf %279, %280 : vector<8x8xf32>
    %282 = math.tanh %281 : vector<8x8xf32>
    %283 = vector.broadcast %36 : f32 to vector<8x8xf32>
    %284 = arith.mulf %283, %282 : vector<8x8xf32>
    %285 = arith.addf %276, %284 : vector<8x8xf32>
    %286 = vector.extract_strided_slice %9 {offsets = [0, 27], sizes = [8, 1], strides = [1, 1]} : vector<8x32xf32> to vector<8x1xf32>
    %287 = vector.extract_strided_slice %8 {offsets = [27, 0], sizes = [1, 8], strides = [1, 1]} : vector<32x8xf32> to vector<1x8xf32>
    %288 = vector.broadcast %286 : vector<8x1xf32> to vector<8x8xf32>
    %289 = vector.broadcast %287 : vector<1x8xf32> to vector<8x8xf32>
    %290 = arith.addf %288, %289 : vector<8x8xf32>
    %291 = math.tanh %290 : vector<8x8xf32>
    %292 = vector.broadcast %37 : f32 to vector<8x8xf32>
    %293 = arith.mulf %292, %291 : vector<8x8xf32>
    %294 = arith.addf %285, %293 : vector<8x8xf32>
    %295 = vector.extract_strided_slice %9 {offsets = [0, 28], sizes = [8, 1], strides = [1, 1]} : vector<8x32xf32> to vector<8x1xf32>
    %296 = vector.extract_strided_slice %8 {offsets = [28, 0], sizes = [1, 8], strides = [1, 1]} : vector<32x8xf32> to vector<1x8xf32>
    %297 = vector.broadcast %295 : vector<8x1xf32> to vector<8x8xf32>
    %298 = vector.broadcast %296 : vector<1x8xf32> to vector<8x8xf32>
    %299 = arith.addf %297, %298 : vector<8x8xf32>
    %300 = math.tanh %299 : vector<8x8xf32>
    %301 = vector.broadcast %38 : f32 to vector<8x8xf32>
    %302 = arith.mulf %301, %300 : vector<8x8xf32>
    %303 = arith.addf %294, %302 : vector<8x8xf32>
    %304 = vector.extract_strided_slice %9 {offsets = [0, 29], sizes = [8, 1], strides = [1, 1]} : vector<8x32xf32> to vector<8x1xf32>
    %305 = vector.extract_strided_slice %8 {offsets = [29, 0], sizes = [1, 8], strides = [1, 1]} : vector<32x8xf32> to vector<1x8xf32>
    %306 = vector.broadcast %304 : vector<8x1xf32> to vector<8x8xf32>
    %307 = vector.broadcast %305 : vector<1x8xf32> to vector<8x8xf32>
    %308 = arith.addf %306, %307 : vector<8x8xf32>
    %309 = math.tanh %308 : vector<8x8xf32>
    %310 = vector.broadcast %39 : f32 to vector<8x8xf32>
    %311 = arith.mulf %310, %309 : vector<8x8xf32>
    %312 = arith.addf %303, %311 : vector<8x8xf32>
    %313 = vector.extract_strided_slice %9 {offsets = [0, 30], sizes = [8, 1], strides = [1, 1]} : vector<8x32xf32> to vector<8x1xf32>
    %314 = vector.extract_strided_slice %8 {offsets = [30, 0], sizes = [1, 8], strides = [1, 1]} : vector<32x8xf32> to vector<1x8xf32>
    %315 = vector.broadcast %313 : vector<8x1xf32> to vector<8x8xf32>
    %316 = vector.broadcast %314 : vector<1x8xf32> to vector<8x8xf32>
    %317 = arith.addf %315, %316 : vector<8x8xf32>
    %318 = math.tanh %317 : vector<8x8xf32>
    %319 = vector.broadcast %40 : f32 to vector<8x8xf32>
    %320 = arith.mulf %319, %318 : vector<8x8xf32>
    %321 = arith.addf %312, %320 : vector<8x8xf32>
    %322 = vector.extract_strided_slice %9 {offsets = [0, 31], sizes = [8, 1], strides = [1, 1]} : vector<8x32xf32> to vector<8x1xf32>
    %323 = vector.extract_strided_slice %8 {offsets = [31, 0], sizes = [1, 8], strides = [1, 1]} : vector<32x8xf32> to vector<1x8xf32>
    %324 = vector.broadcast %322 : vector<8x1xf32> to vector<8x8xf32>
    %325 = vector.broadcast %323 : vector<1x8xf32> to vector<8x8xf32>
    %326 = arith.addf %324, %325 : vector<8x8xf32>
    %327 = math.tanh %326 : vector<8x8xf32>
    %328 = vector.broadcast %41 : f32 to vector<8x8xf32>
    %329 = arith.mulf %328, %327 : vector<8x8xf32>
    %330 = arith.addf %321, %329 : vector<8x8xf32>
    %c0_47 = arith.constant 0 : index
    %c0_48 = arith.constant 0 : index
    %331 = vector.load %arg9[%c0_47, %c0_48] : memref<8x8xf32, #tpu.memory_space<vmem>>, vector<8x8xf32>
    tpu.vector_store %arg9[%c0_47, %c0_48], %330 {strides = array<i32>} : memref<8x8xf32, #tpu.memory_space<vmem>>, vector<8x8xf32>,
    %c0_49 = arith.constant 0 : index
    %c0_50 = arith.constant 0 : index
    %332 = vector.load %arg9[%c0_49, %c0_50] : memref<8x8xf32, #tpu.memory_space<vmem>>, vector<8x8xf32>
    %cst_51 = arith.constant dense<0xFF800000> : vector<8xf32>
    %333 = vector.multi_reduction <maximumf>, %332, %cst_51 [1] : vector<8x8xf32> to vector<8xf32>
    %334 = vector.shape_cast %333 : vector<8xf32> to vector<8x1xf32>
    %335 = vector.broadcast %334 : vector<8x1xf32> to vector<8x8xf32>
    %336 = arith.subf %332, %335 : vector<8x8xf32>
    %337 = math.exp %336 : vector<8x8xf32>
    %cst_52 = arith.constant dense<0.000000e+00> : vector<8xf32>
    %338 = vector.multi_reduction <add>, %337, %cst_52 [1] : vector<8x8xf32> to vector<8xf32>
    %339 = vector.shape_cast %338 : vector<8xf32> to vector<8x1xf32>
    %340 = tpu.reciprocal %339 {approx = true} : vector<8x1xf32> -> vector<8x1xf32>
    %341 = arith.mulf %339, %340 : vector<8x1xf32>
    %cst_53 = arith.constant 2.000000e+00 : f32
    %342 = vector.broadcast %cst_53 : f32 to vector<8x1xf32>
    %343 = arith.subf %342, %341 : vector<8x1xf32>
    %344 = arith.mulf %340, %343 : vector<8x1xf32>
    %345 = vector.broadcast %344 : vector<8x1xf32> to vector<8x8xf32>
    %346 = arith.mulf %337, %345 : vector<8x8xf32>
    %cst_54 = arith.constant dense<0.000000e+00> : vector<8x16xf32>
    %347 = tpu.matmul %346, %1, %cst_54 {dimension_numbers = #tpu.dot_dimension_numbers<[1], [0], [0], [1], [0, 0, 1, 1], [], []>} : vector<8x8xf32>, vector<8x16xf32>, vector<8x16xf32> -> vector<8x16xf32>
    %c0_55 = arith.constant 0 : index
    %c0_56 = arith.constant 0 : index
    %c0_57 = arith.constant 0 : index
    %348 = vector.load %arg8[%c0_55, %c0_56, %c0_57] : memref<1x8x16xf32, #tpu.memory_space<vmem>>, vector<1x8x16xf32>
    %349 = vector.shape_cast %348 : vector<1x8x16xf32> to vector<8x16xf32>
    %350 = vector.shape_cast %347 : vector<8x16xf32> to vector<1x8x16xf32>
    tpu.vector_store %arg8[%c0_55, %c0_56, %c0_57], %350 {strides = array<i32>} : memref<1x8x16xf32, #tpu.memory_space<vmem>>, vector<1x8x16xf32>,
    return
  }
  func.func @transform_0(%arg0: i32, %arg1: i32) -> (i32, i32, i32) {
    %c0_i32 = arith.constant 0 : i32
    %c0_i32_0 = arith.constant 0 : i32
    %c0_i32_1 = arith.constant 0 : i32
    return %arg0, %c0_i32, %c0_i32_0 : i32, i32, i32
  }
  func.func @transform_1(%arg0: i32, %arg1: i32) -> (i32, i32, i32) {
    %c0_i32 = arith.constant 0 : i32
    %c0_i32_0 = arith.constant 0 : i32
    %c0_i32_1 = arith.constant 0 : i32
    return %arg0, %c0_i32, %c0_i32_0 : i32, i32, i32
  }
  func.func @transform_2(%arg0: i32, %arg1: i32) -> (i32, i32, i32) {
    %c0_i32 = arith.constant 0 : i32
    %c0_i32_0 = arith.constant 0 : i32
    return %arg0, %arg1, %c0_i32 : i32, i32, i32
  }
  func.func @transform_3(%arg0: i32, %arg1: i32) -> (i32, i32) {
    %c0_i32 = arith.constant 0 : i32
    %c0_i32_0 = arith.constant 0 : i32
    %c0_i32_1 = arith.constant 0 : i32
    return %c0_i32, %c0_i32_0 : i32, i32
  }
  func.func @transform_4(%arg0: i32, %arg1: i32) -> (i32, i32) {
    %c0_i32 = arith.constant 0 : i32
    %c0_i32_0 = arith.constant 0 : i32
    %c0_i32_1 = arith.constant 0 : i32
    return %c0_i32, %c0_i32_0 : i32, i32
  }
  func.func @transform_5(%arg0: i32, %arg1: i32) -> (i32, i32) {
    %c0_i32 = arith.constant 0 : i32
    %c0_i32_0 = arith.constant 0 : i32
    %c0_i32_1 = arith.constant 0 : i32
    return %c0_i32, %c0_i32_0 : i32, i32
  }
  func.func @transform_6(%arg0: i32, %arg1: i32) -> (i32, i32, i32) {
    %c0_i32 = arith.constant 0 : i32
    %c0_i32_0 = arith.constant 0 : i32
    return %arg0, %arg1, %c0_i32 : i32, i32, i32
  }
}

</mosaic_0001>

<bundles_post_ra>
// kernel: tpu_custom_call.1
= control target key start
LH: loop header
LB: loop body
LE: loop exit
PB: predicated region body
PF: predicated region fallthrough
CT: control target
= control target key end

     0   :  { %11 = vsyncpa [#allocation5], 0  ;;  %s1587_s0 = inlined_call_operand.vmem [shape: f32[2,8,16], index: 0, kind: input, shape index: {}]   ;;  %s1588_s1 = inlined_call_operand.vmem [shape: f32[2,16,8], index: 1, kind: input, shape index: {}]   ;;  %s1589_s2 = inlined_call_operand.vmem [shape: f32[2,8,24], index: 2, kind: input, shape index: {}]   ;;  %s1590_s3 = inlined_call_operand.vmem [shape: f32[32,16], index: 3, kind: input, shape index: {}]   ;;  %s1591_s4 = inlined_call_operand.vmem [shape: f32[24,32], index: 4, kind: input, shape index: {}]   ;;  %s1592_s5 = inlined_call_operand.vmem [shape: f32[1,32], index: 5, kind: input, shape index: {}]   ;;  %s1593_s6 = inlined_call_operand.hbm [shape: f32[2,8,16], index: 6, kind: output, shape index: {}]  }
   0x1   :  { %12 = vsyncpa [#allocation4], 0 }
   0x2   :  { %14 = vsyncpa [#allocation4 + $0x1], 0  ;;  %s1340_s21 = smov 0   ;;  %s1342_s22 = smov 0  }
   0x3   :  { %s1344_s23 = smov 0   ;;  %s1346_s24 = smov 0  }
   0x4   :  { %s1348_s25 = smov 0   ;;  %s1350_s26 = smov 0  }
   0x5 LB: > { %s918_s27 = sadd.s32 4294967295, %s1270_s26   ;;  %s919_s28 = sadd.s32 4294967294, %s1270_s26   ;;  %s1270_s26 = sphi %s1350_s26, %s20_s26   ;;  %s1266_s25 = sphi %s1348_s25, %s1600_s25   ;;  %s1262_s24 = sphi %s1346_s24, %s1599_s24   ;;  %s1258_s23 = sphi %s1344_s23, %s1598_s23   ;;  %s1254_s22 = sphi %s1342_s22, %s1597_s22   ;;  %s1250_s21 = sphi %s1340_s21, %s1596_s21  }
   0x6   : > { %s32_s29 = sadd.s32 1, %s1266_s25  ;;  %s184_s30 = sadd.s32 1, %s1258_s23 }
   0x7   : > { %p34_p0 = scmp.ge.s32.totalorder %s32_s29, 2  ;;  %p194_p1 = scmp.ne.s32.totalorder %s1258_s23, %s1254_s22 }
   0x8   : > { %p195_p2 = scmp.eq.s32.totalorder %s918_s27, 1  ;;  %p200_p3 = scmp.ne.s32.totalorder %s1254_s22, %s1250_s21 }
   0x9   : > { %s1602_s29 = smov (%p34_p0, %s32_s29), 0  ;;  %p201_p5 = scmp.eq.s32.totalorder %s919_s28, 1 }
   0xa   : > { %p1380_p4 = por %p195_p2, %p194_p1  ;;  %s179_s8 = ssub.s32 %s1266_s25, %s1602_s29 }
   0xb   : > { %p920_p6 = scmp.ge.s32.totalorder %s1270_s26, 1  ;;  %p182_p7 = scmp.eq.s32.totalorder %s179_s8, 0 }
   0xc   : > { %p1387_p8 = por %p201_p5, %p200_p3  ;;  %p208_p9 = scmp.lt.s32.totalorder %s1270_s26, 3 }
   0xd   : > { %s1393_s10 = scalar_select %p182_p7, %s1258_s23, %s184_s30  }
   0xe   : > { %p209_p10 = pnand %p920_p6, %p208_p9  ;;  %p988_p11 = scmp.eq.s32.totalorder %s918_s27, 0 }
   0xf   : > { %s226_s13 = sshll.u32 %s1592_s5, 4  ;;  %s1272_s14 = smov [#allocation3]   ;;  %s227_s13 = int_to_ptr.vmem [resolvable:$true] %s226_s13 }
  0x10   : > { %p980_p12 = pneg %p209_p10  ;;  %264 = sbr.rel (%p209_p10) target bundleno = 799 (0x31f), region = 44 }
  0x12   : > { %p981_p13 = pnand %p988_p11, %p980_p12 }
  0x14   : > { %983 = dma.vmem_to_smem (!%p981_p13), %s227_s13, 16, %s1272_s14, [#allocation5]  }
  0x15   : > { %1241 = dma.done.wait (%p988_p11), [#allocation5], 16  }
  0x16   : > { %1243 = vsyncadd (%p988_p11), [#allocation5], 4294967280 }
  0x17   : > { %271 = sfence }
  0x18   : > { %v333_v0 = vld [vmem:[%s1591_s4 + $0x10] sm:$0xff]  ;;  %v332_v1 = vld [vmem:[%s1591_s4 + $0x8] sm:$0xff]  ;;  %p307_p0 = scmp.lt.s32.totalorder %s1262_s24, 1  ;;  %v331_v2 = vld [vmem:[%s1591_s4] sm:$0xff]  ;;  %v1273_v3 = vmov 4   ;;  %v1274_v4 = vmov 2  }
  0x19   : > { %393 = vmatpush.msra.mxu1 %v333_v0  ;;  %1076 = vset.pattern.permute.xlu2 %v1273_v3  ;;  %v1275_v5 = vmov 0   ;;  %vm376_vm0 = vcmask 195584   ;;  %v327_v9 = vld [vmem:[%s1590_s3] sm:$0xff]  ;;  %vm334_vm1 = vcmask 130048   ;;  %v328_v10 = vld [vmem:[%s1590_s3 + $0x8] sm:$0xff]  ;;  %v329_v11 = vld [vmem:[%s1590_s3 + $0x10] sm:$0xff] }
  0x1a   : > { %s1409_s27 = scalar_select %p307_p0, %s1262_s24, 1  ;;  %1074 = vset.pattern.permute.xlu1 %v1274_v4  ;;  %1072 = vset.pattern.permute.xlu0 %v1275_v5  ;;  %v330_v12 = vld [vmem:[%s1590_s3 + $0x18] sm:$0xff]  ;;  %v1276_v14 = vmov 5   ;;  %v1277_v15 = vmov 3   ;;  %v1278_v16 = vmov 1   ;;  %v1279_v17 = vmov 7  }
  0x1b   : > { %394 = vmatpush.msra.mxu1 %v332_v1  ;;  %v1280_v18 = vmov 6   ;;  %v1281_v19 = vmov 8   ;;  %v1282_v20 = vmov 10   ;;  %v1283_v21 = vmov 9   ;;  %s935_s13 = sld [smem:[#allocation3 + $0x1]] }
  0x1c   : > { %s926_s28 = sshll.u32 %s1409_s27, 3  ;;  %s971_s30 = sshll.u32 %s1409_s27, 4  ;;  %v1284_v22 = vmov 13   ;;  %v1285_v23 = vmov 12   ;;  %v1286_v24 = vmov 11   ;;  %v1287_v25 = vmov 18  }
  0x1d   : > { %395 = vmatpush.msra.mxu1 %v331_v2  ;;  %s322_s12 = scalar_lea.vmem %s1589_s2, %s926_s28  ;;  %s315_s15 = scalar_lea.vmem %s1588_s1, %s971_s30  ;;  %v1288_v26 = vmov 15   ;;  %v1289_v27 = vmov 14   ;;  %v1290_v28 = vmov 23   ;;  %v1291_v29 = vmov 17  }
  0x1e   : > { %v326_v6 = vld [vmem:[%s322_s12] sm:$0xff]  ;;  %v325_v7 = vld [vmem:[%s315_s15 + $0x8] sm:$0xff]  ;;  %v1292_v30 = vmov 16   ;;  %v1293_v31 = vmov 28   ;;  %v1294_v32 = vmov 20   ;;  %v1295_v33 = vmov 19  }
  0x1f   : > { %v324_v8 = vld [vmem:[%s315_s15] sm:$0xff]  ;;  %934 = vmatmul.msk.f32.vlgmr.msra.gmra.mxu1 %vm376_vm0, %v326_v6  ;;  %361 = vmatpush.msra.mxu0 %v325_v7  ;;  %v1296_v34 = vmov 22   ;;  %v1297_v35 = vmov 21   ;;  %v1298_v36 = vmov 31   ;;  %v1299_v37 = vmov 25   ;;  %s400_s12 = sld [smem:[#allocation3]] }
  0x20   : > { %972 = vmatpush.msra.mxu3 %v325_v7  ;;  %v1300_v38 = vmov 24   ;;  %v1301_v39 = vmov 27   ;;  %v1302_v40 = vmov 26   ;;  %v1303_v41 = vmov 30   ;;  %s936_s14 = sld [smem:[#allocation3 + $0x2]] }
  0x21   : > { %362 = vmatpush.msra.mxu0 %v324_v8  ;;  %v1304_v42 = vmov 29   ;;  %s937_s15 = sld [smem:[#allocation3 + $0x3]]  ;;  %v450_v62 = vstv %s935_s13  ;;  %vm753_vm2 = vcmask 64512  }
  0x22   : > { %930 = vmatmul.msk.f32.vlgmr.msra.gmra.mxu0 %vm334_vm1, %v327_v9  ;;  %973 = vmatpush.msra.mxu3 %v324_v8  ;;  %s938_s16 = sld [smem:[#allocation3 + $0x4]] }
  0x23   : > { %932 = vmatmul.msk.f32.vlgmr.msra.gmra.mxu3 %vm334_vm1, %v329_v11  ;;  %s939_s17 = sld [smem:[#allocation3 + $0x5]] }
  0x24   : > { %s940_s18 = sld [smem:[#allocation3 + $0x6]] }
  0x25   : > { %v440_v61 = vstv %s400_s12  ;;  %s941_s19 = sld [smem:[#allocation3 + $0x7]] }
  0x26   : > { %v460_v6 = vstv %s936_s14  ;;  %s942_s20 = sld [smem:[#allocation3 + $0x8]] }
  0x27   : > { %s943_s30 = sld [smem:[#allocation3 + $0x9]] }
  0x28   : > { %s1477_s8 = sld [smem:[#allocation3 + $0xa]] }
  0x29   : > { %s1480_s11 = sld [smem:[#allocation3 + $0xb]] }
  0x2a   : > { %931 = vmatmul.msk.f32.gmra.mxu0 %vm334_vm1, %v328_v10  ;;  %s1484_s12 = sld [smem:[#allocation3 + $0xc]] }
  0x2b   : > { %933 = vmatmul.msk.f32.gmra.mxu3 %vm334_vm1, %v330_v12  ;;  %s1489_s13 = sld [smem:[#allocation3 + $0xd]] }
  0x2c   : > { %s948_s14 = sld [smem:[#allocation3 + $0xe]] }
  0x9c   : > { %v1437_v13 = vpop.f32.mrf.mxu1 }
  0x9d   : > { %474 = vperm.xlu2 %1076, %v1437_v13   ;;  %454 = vperm.xlu1 %1074, %v1437_v13  }
  0x9e   : > { %434 = vperm.xlu0 %1072, %v1437_v13  }
  0x9f   : > { %v364_v46 = vpop.f32.mrf.mxu0 }
  0xa0   : > { %v437_v48 = vperm.slane %v364_v46, 0  ;;  %v447_v49 = vperm.slane %v364_v46, 1  ;;  %v457_v50 = vperm.slane %v364_v46, 2  ;;  %v467_v56 = vperm.slane %v364_v46, 3 }
  0xa1   : > { %v477_v58 = vperm.slane %v364_v46, 4  ;;  %v487_v2 = vperm.slane %v364_v46, 5  ;;  %v497_v7 = vperm.slane %v364_v46, 6 }
  0xa5   : > { %1077 = vset.pattern.permute.xlu2 %v1276_v14  ;;  %1075 = vset.pattern.permute.xlu1 %v1277_v15 }
  0xa6   : > { %1073 = vset.pattern.permute.xlu0 %v1278_v16  ;;  %484 = vperm.xlu2 %1077, %v1437_v13   ;;  %v507_v16 = vperm.slane %v364_v46, 7 }
  0xa7   : > { %464 = vperm.xlu1 %1075, %v1437_v13   ;;  %444 = vperm.xlu0 %1073, %v1437_v13  }
  0xae   : > { %1079 = vset.pattern.permute.xlu2 %v1279_v17 }
  0xaf   : > { %1078 = vset.pattern.permute.xlu1 %v1280_v18  ;;  %1080 = vset.pattern.permute.xlu0 %v1281_v19 }
  0xb0   : > { %504 = vperm.xlu2 %1079, %v1437_v13   ;;  %494 = vperm.xlu1 %1078, %v1437_v13  }
  0xb1   : > { %514 = vperm.xlu0 %1080, %v1437_v13  }
  0xb8   : > { %1082 = vset.pattern.permute.xlu2 %v1282_v20  ;;  %1081 = vset.pattern.permute.xlu1 %v1283_v21  ;;  %v480_v20 = vstv %s938_s16  ;;  %v1471_v21 = vpop.f32.mrf.mxu0  ;;  %s1498_s16 = sld [smem:[#allocation3 + $0x10]] }
  0xb9   : > { %1085 = vset.pattern.permute.xlu0 %v1284_v22  ;;  %534 = vperm.xlu2 %1082, %v1437_v13  }
  0xba   : > { %524 = vperm.xlu1 %1081, %v1437_v13   ;;  %564 = vperm.xlu0 %1085, %v1437_v13  }
  0xc1   : > { %1084 = vset.pattern.permute.xlu2 %v1285_v23  ;;  %v517_v23 = vperm.slane %v1471_v21, 0 }
  0xc2   : > { %1083 = vset.pattern.permute.xlu1 %v1286_v24  ;;  %1090 = vset.pattern.permute.xlu0 %v1287_v25 }
  0xc3   : > { %554 = vperm.xlu2 %1084, %v1437_v13   ;;  %544 = vperm.xlu1 %1083, %v1437_v13  }
  0xc4   : > { %614 = vperm.xlu0 %1090, %v1437_v13  }
  0xcb   : > { %1087 = vset.pattern.permute.xlu2 %v1288_v26  ;;  %1086 = vset.pattern.permute.xlu1 %v1289_v27  ;;  %v527_v26 = vperm.slane %v1471_v21, 1 }
  0xcc   : > { %1095 = vset.pattern.permute.xlu0 %v1290_v28  ;;  %584 = vperm.xlu2 %1087, %v1437_v13  }
  0xcd   : > { %574 = vperm.xlu1 %1086, %v1437_v13   ;;  %664 = vperm.xlu0 %1095, %v1437_v13  }
  0xd4   : > { %1089 = vset.pattern.permute.xlu2 %v1291_v29 }
  0xd5   : > { %1088 = vset.pattern.permute.xlu1 %v1292_v30  ;;  %1100 = vset.pattern.permute.xlu0 %v1293_v31  ;;  %v490_v30 = vstv %s939_s17  ;;  %s1503_s17 = sld [smem:[#allocation3 + $0x11]] }
  0xd6   : > { %604 = vperm.xlu2 %1089, %v1437_v13   ;;  %594 = vperm.xlu1 %1088, %v1437_v13  }
  0xd7   : > { %714 = vperm.xlu0 %1100, %v1437_v13  }
  0xde   : > { %1092 = vset.pattern.permute.xlu2 %v1294_v32  ;;  %1091 = vset.pattern.permute.xlu1 %v1295_v33 }
  0xdf   : > { %634 = vperm.xlu2 %1092, %v1437_v13   ;;  %624 = vperm.xlu1 %1091, %v1437_v13  }
  0xe0   : > { %1104 = vset.pattern.permute.xlu0 %v1298_v36 }
  0xe7   : > { %1094 = vset.pattern.permute.xlu2 %v1296_v34  ;;  %1093 = vset.pattern.permute.xlu1 %v1297_v35  ;;  %v500_v34 = vstv %s940_s18  ;;  %s1507_s18 = sld [smem:[#allocation3 + $0x12]] }
  0xe8   : > { %654 = vperm.xlu2 %1094, %v1437_v13   ;;  %644 = vperm.xlu1 %1093, %v1437_v13  }
  0xf0   : > { %1097 = vset.pattern.permute.xlu2 %v1299_v37  ;;  %1096 = vset.pattern.permute.xlu1 %v1300_v38  ;;  %v537_v37 = vperm.slane %v1471_v21, 2  ;;  %v547_v38 = vperm.slane %v1471_v21, 3 }
  0xf1   : > { %684 = vperm.xlu2 %1097, %v1437_v13   ;;  %674 = vperm.xlu1 %1096, %v1437_v13  }
  0xf7   : > { %v475_v43 = vpop.permute.xlu2 %474 }
  0xf8   : > { %v478_v1 = vadd.f32 %v477_v58, %v475_v43  ;;  %v577_v58 = vperm.slane %v1471_v21, 6 }
  0xf9   : > { %1099 = vset.pattern.permute.xlu2 %v1301_v39  ;;  %1098 = vset.pattern.permute.xlu1 %v1302_v40 }
  0xfa   : > { %704 = vperm.xlu2 %1099, %v1437_v13   ;;  %694 = vperm.xlu1 %1098, %v1437_v13  }
 0x100   : > { %v485_v47 = vpop.permute.xlu2 %484 }
 0x101   : > { %v488_v10 = vadd.f32 %v487_v2, %v485_v47  ;;  %v540_v2 = vstv %s1477_s8  ;;  %s956_s8 = sld [smem:[#allocation3 + $0x16]] }
 0x102   : > { %1102 = vset.pattern.permute.xlu2 %v1303_v41  ;;  %1101 = vset.pattern.permute.xlu1 %v1304_v42 }
 0x103   : > { %734 = vperm.xlu2 %1102, %v1437_v13   ;;  %724 = vperm.xlu1 %1101, %v1437_v13  }
 0x10a   : > { %v505_v57 = vpop.permute.xlu2 %504 }
 0x10b   : > { %1103 = vset.pattern.permute.xlu1 %v1298_v36  ;;  %v508_v24 = vadd.f32 %v507_v16, %v505_v57  ;;  %v560_v16 = vstv %s1484_s12  ;;  %s958_s12 = sld [smem:[#allocation3 + $0x18]] }
 0x10c   : > { %744 = vperm.xlu1 %1103, %v1437_v13   ;;  %v470_v13 = vstv %s937_s15  ;;  %s1495_s15 = sld [smem:[#allocation3 + $0xf]] }
 0x10f   : > { %v455_v44 = vpop.permute.xlu1 %454 }
 0x110   : > { %v435_v45 = vpop.permute.xlu0 %434  ;;  %v458_v55 = vadd.f32 %v457_v50, %v455_v44  ;;  %v510_v44 = vstv %s941_s19  ;;  %s953_s19 = sld [smem:[#allocation3 + $0x13]] }
 0x111   : > { %v438_v51 = vadd.f32 %v437_v48, %v435_v45  ;;  %v557_v48 = vperm.slane %v1471_v21, 4 }
 0x113   : > { %1105 = vtanh.f32 %v438_v51  ;;  %v535_v8 = vpop.permute.xlu2 %534 }
 0x114   : > { %v538_v42 = vadd.f32 %v537_v37, %v535_v8 }
 0x119   : > { %v465_v52 = vpop.permute.xlu1 %464  ;;  %v445_v53 = vpop.permute.xlu0 %444 }
 0x11a   : > { %v448_v54 = vadd.f32 %v447_v49, %v445_v53  ;;  %v468_v59 = vadd.f32 %v467_v56, %v465_v52  ;;  %v1106_v60 = vpop.eup %1105  ;;  %v520_v52 = vstv %s942_s20  ;;  %v530_v53 = vstv %s943_s30  ;;  %s1512_s20 = sld [smem:[#allocation3 + $0x14]] }
 0x11b   : > { %v441_v3 = vmul.f32 %v1106_v60, %v440_v61  ;;  %s1515_s30 = sld [smem:[#allocation3 + $0x15]] }
 0x11c   : > { %1107 = vtanh.f32 %v448_v54 }
 0x11d   : > { %1109 = vtanh.f32 %v458_v55  ;;  %v555_v28 = vpop.permute.xlu2 %554  ;;  %v567_v55 = vperm.slane %v1471_v21, 5 }
 0x11e   : > { %1111 = vtanh.f32 %v468_v59  ;;  %v558_v56 = vadd.f32 %v557_v48, %v555_v28 }
 0x11f   : > { %1113 = vtanh.f32 %v478_v1 }
 0x120   : > { %1115 = vtanh.f32 %v488_v10 }
 0x122   : > { %v495_v63 = vpop.permute.xlu1 %494  ;;  %v1108_v0 = vpop.eup %1107 }
 0x123   : > { %v451_v4 = vmul.f32 %v1108_v0, %v450_v62  ;;  %v1110_v5 = vpop.eup %1109  ;;  %v498_v14 = vadd.f32 %v497_v7, %v495_v63  ;;  %v515_v25 = vpop.permute.xlu0 %514 }
 0x124   : > { %v461_v11 = vmul.f32 %v1110_v5, %v460_v6  ;;  %v1112_v12 = vpop.eup %1111  ;;  %v518_v32 = vadd.f32 %v517_v23, %v515_v25  ;;  %v587_v5 = vperm.slane %v1471_v21, 7  ;;  %v1491_v7 = vpop.f32.mrf.mxu3  ;;  %v570_v23 = vstv %s1489_s13  ;;  %s1528_s13 = sld [smem:[#allocation3 + $0x19]] }
 0x125   : > { %v452_v9 = vadd.f32 %v451_v4, %v441_v3  ;;  %v471_v17 = vmul.f32 %v1112_v12, %v470_v13  ;;  %v1114_v19 = vpop.eup %1113  ;;  %1117 = vtanh.f32 %v498_v14  ;;  %v550_v3 = vstv %s1480_s11  ;;  %s1524_s11 = sld [smem:[#allocation3 + $0x17]] }
 0x126   : > { %v481_v27 = vmul.f32 %v1114_v19, %v480_v20  ;;  %v1116_v29 = vpop.eup %1115  ;;  %1119 = vtanh.f32 %v508_v24  ;;  %v585_v47 = vpop.permute.xlu2 %584  ;;  %v607_v19 = vperm.slane %v1491_v7, 1  ;;  %v580_v24 = vstv %s948_s14  ;;  %s1531_s14 = sld [smem:[#allocation3 + $0x1a]] }
 0x127   : > { %v462_v15 = vadd.f32 %v461_v11, %v452_v9  ;;  %v491_v36 = vmul.f32 %v1116_v29, %v490_v30  ;;  %1121 = vtanh.f32 %v518_v32  ;;  %v597_v9 = vperm.slane %v1491_v7, 0 }
 0x128   : > { %v588_v12 = vadd.f32 %v587_v5, %v585_v47  ;;  %v627_v30 = vperm.slane %v1491_v7, 3 }
 0x129   : > { %v472_v22 = vadd.f32 %v471_v17, %v462_v15 }
 0x12b   : > { %v482_v31 = vadd.f32 %v481_v27, %v472_v22  ;;  %v1118_v33 = vpop.eup %1117 }
 0x12c   : > { %v525_v18 = vpop.permute.xlu1 %524  ;;  %v501_v41 = vmul.f32 %v1118_v33, %v500_v34  ;;  %v1120_v43 = vpop.eup %1119 }
 0x12d   : > { %v528_v35 = vadd.f32 %v527_v26, %v525_v18  ;;  %v492_v40 = vadd.f32 %v491_v36, %v482_v31  ;;  %v1122_v49 = vpop.eup %1121  ;;  %v511_v50 = vmul.f32 %v1120_v43, %v510_v44  ;;  %v565_v57 = vpop.permute.xlu0 %564  ;;  %v617_v26 = vperm.slane %v1491_v7, 2 }
 0x12e   : > { %v521_v60 = vmul.f32 %v1122_v49, %v520_v52  ;;  %v568_v0 = vadd.f32 %v567_v55, %v565_v57 }
 0x12f   : > { %1123 = vtanh.f32 %v528_v35  ;;  %v502_v46 = vadd.f32 %v501_v41, %v492_v40  ;;  %v637_v41 = vperm.slane %v1491_v7, 4 }
 0x130   : > { %1125 = vtanh.f32 %v538_v42  ;;  %v605_v8 = vpop.permute.xlu2 %604 }
 0x131   : > { %v512_v54 = vadd.f32 %v511_v50, %v502_v46  ;;  %v608_v28 = vadd.f32 %v607_v19, %v605_v8  ;;  %v610_v50 = vstv %s1503_s17  ;;  %v660_v19 = vstv %s956_s8  ;;  %s963_s17 = sld [smem:[#allocation3 + $0x1d]]  ;;  %s310_s8 = scalar_lea.vmem %s1587_s0, %s926_s28 }
 0x133   : > { %v522_v63 = vadd.f32 %v521_v60, %v512_v54  ;;  %v667_v60 = vperm.slane %v1491_v7, 7 }
 0x135   : > { %v545_v39 = vpop.permute.xlu1 %544  ;;  %v1124_v51 = vpop.eup %1123 }
 0x136   : > { %v548_v45 = vadd.f32 %v547_v38, %v545_v39  ;;  %v531_v61 = vmul.f32 %v1124_v51, %v530_v53  ;;  %v1126_v62 = vpop.eup %1125  ;;  %v615_v29 = vpop.permute.xlu0 %614  ;;  %v590_v38 = vstv %s1495_s15  ;;  %v600_v39 = vstv %s1498_s16  ;;  %s961_s15 = sld [smem:[#allocation3 + $0x1b]] }
 0x137   : > { %v541_v10 = vmul.f32 %v1126_v62, %v540_v2  ;;  %v618_v35 = vadd.f32 %v617_v26, %v615_v29  ;;  %v657_v53 = vperm.slane %v1491_v7, 6  ;;  %v670_v29 = vstv %s1524_s11  ;;  %s962_s16 = sld [smem:[#allocation3 + $0x1c]]  ;;  %s304_s11 = sand.u32 1, %s1254_s22  }
 0x138   : > { %1127 = vtanh.f32 %v548_v45  ;;  %v532_v6 = vadd.f32 %v531_v61, %v522_v63  ;;  %v647_v45 = vperm.slane %v1491_v7, 5 }
 0x139   : > { %1129 = vtanh.f32 %v558_v56  ;;  %v635_v27 = vpop.permute.xlu2 %634 }
 0x13a   : > { %1131 = vtanh.f32 %v568_v0  ;;  %v542_v13 = vadd.f32 %v541_v10, %v532_v6  ;;  %v638_v46 = vadd.f32 %v637_v41, %v635_v27  ;;  %v1519_v0 = vpop.f32.mrf.mxu3  ;;  %v640_v10 = vstv %s1512_s20 }
 0x13b   : > { %v690_v41 = vstv %s1528_s13  ;;  %s968_s13 = sshll.u32 %s1262_s24, 3 }
 0x13e   : > { %v1128_v1 = vpop.eup %1127 }
 0x13f   : > { %v575_v59 = vpop.permute.xlu1 %574  ;;  %v551_v11 = vmul.f32 %v1128_v1, %v550_v3  ;;  %v1130_v15 = vpop.eup %1129  ;;  %v677_v3 = vperm.slane %v1519_v0, 0 }
 0x140   : > { %v578_v4 = vadd.f32 %v577_v58, %v575_v59  ;;  %v1132_v20 = vpop.eup %1131  ;;  %v561_v21 = vmul.f32 %v1130_v15, %v560_v16  ;;  %v620_v58 = vstv %s1507_s18  ;;  %v630_v59 = vstv %s953_s19  ;;  %v665_v62 = vpop.permute.xlu0 %664  ;;  %s964_s18 = sld [smem:[#allocation3 + $0x1e]] }
 0x141   : > { %v552_v18 = vadd.f32 %v551_v11, %v542_v13  ;;  %v571_v31 = vmul.f32 %v1132_v20, %v570_v23  ;;  %v668_v5 = vadd.f32 %v667_v60, %v665_v62  ;;  %v650_v11 = vstv %s1515_s30  ;;  %s965_s19 = sld [smem:[#allocation3 + $0x1f]] }
 0x142   : > { %1133 = vtanh.f32 %v578_v4  ;;  %v655_v47 = vpop.permute.xlu2 %654  ;;  %v707_v23 = vperm.slane %v1519_v0, 3  ;;  %v730_v60 = vstv %s963_s17 }
 0x143   : > { %1135 = vtanh.f32 %v588_v12  ;;  %v562_v25 = vadd.f32 %v561_v21, %v552_v18  ;;  %v658_v63 = vadd.f32 %v657_v53, %v655_v47  ;;  %v697_v21 = vperm.slane %v1519_v0, 2 }
 0x145   : > { %v572_v36 = vadd.f32 %v571_v31, %v562_v25 }
 0x148   : > { %v595_v14 = vpop.permute.xlu1 %594  ;;  %v1134_v22 = vpop.eup %1133 }
 0x149   : > { %v598_v17 = vadd.f32 %v597_v9, %v595_v14  ;;  %v581_v32 = vmul.f32 %v1134_v22, %v580_v24  ;;  %v1136_v34 = vpop.eup %1135  ;;  %v687_v14 = vperm.slane %v1519_v0, 1 }
 0x14a   : > { %v591_v43 = vmul.f32 %v1136_v34, %v590_v38 }
 0x14b   : > { %1137 = vtanh.f32 %v598_v17  ;;  %v582_v42 = vadd.f32 %v581_v32, %v572_v36  ;;  %v685_v6 = vpop.permute.xlu2 %684  ;;  %v715_v36 = vpop.permute.xlu0 %714 }
 0x14c   : > { %1139 = vtanh.f32 %v608_v28  ;;  %v688_v20 = vadd.f32 %v687_v14, %v685_v6 }
 0x14d   : > { %1141 = vtanh.f32 %v618_v35  ;;  %v592_v48 = vadd.f32 %v591_v43, %v582_v42  ;;  %v700_v42 = vstv %s1531_s14 }
 0x151   : > { %v625_v33 = vpop.permute.xlu1 %624  ;;  %v1138_v37 = vpop.eup %1137 }
 0x152   : > { %v628_v40 = vadd.f32 %v627_v30, %v625_v33  ;;  %v601_v44 = vmul.f32 %v1138_v37, %v600_v39  ;;  %v1140_v49 = vpop.eup %1139  ;;  %v680_v30 = vstv %s958_s12  ;;  %v717_v33 = vperm.slane %v1519_v0, 4  ;;  %s925_s12 = sshll.u32 %s304_s11, 3 }
 0x153   : > { %v1142_v55 = vpop.eup %1141  ;;  %v611_v56 = vmul.f32 %v1140_v49, %v610_v50  ;;  %s306_s28 = scalar_lea.vmem [#allocation6], %s925_s12 }
 0x154   : > { %1143 = vtanh.f32 %v628_v40  ;;  %v602_v51 = vadd.f32 %v601_v44, %v592_v48  ;;  %v621_v1 = vmul.f32 %v1142_v55, %v620_v58  ;;  %v705_v26 = vpop.permute.xlu2 %704  ;;  %v718_v40 = vadd.f32 %v717_v33, %v715_v36 }
 0x155   : > { %1145 = vtanh.f32 %v638_v46  ;;  %v708_v34 = vadd.f32 %v707_v23, %v705_v26  ;;  %v727_v44 = vperm.slane %v1519_v0, 5  ;;  %v737_v46 = vperm.slane %v1519_v0, 6 }
 0x156   : > { %v612_v61 = vadd.f32 %v611_v56, %v602_v51 }
 0x158   : > { %v622_v8 = vadd.f32 %v621_v1, %v612_v61  ;;  %v747_v61 = vperm.slane %v1519_v0, 7 }
 0x15a   : > { %v645_v52 = vpop.permute.xlu1 %644  ;;  %v1144_v57 = vpop.eup %1143 }
 0x15b   : > { %v648_v54 = vadd.f32 %v647_v45, %v645_v52  ;;  %v631_v2 = vmul.f32 %v1144_v57, %v630_v59  ;;  %v1146_v4 = vpop.eup %1145  ;;  %v720_v59 = vstv %s962_s16  ;;  %s808_s16 = sshll.u32 %s306_s28, 4  ;;  %s809_s16 = int_to_ptr.vmem [resolvable:$true] %s808_s16 }
 0x15c   : > { %v641_v15 = vmul.f32 %v1146_v4, %v640_v10  ;;  %v750_v10 = vstv %s965_s19 }
 0x15d   : > { %1147 = vtanh.f32 %v648_v54  ;;  %v632_v12 = vadd.f32 %v631_v2, %v622_v8  ;;  %v735_v49 = vpop.permute.xlu2 %734  ;;  %v710_v54 = vstv %s961_s15  ;;  %v740_v8 = vstv %s964_s18  ;;  %s806_s15 = scalar_lea.hbm %s1593_s6, %s968_s13  ;;  %s795_s18 = scalar_lea.sflag [#allocation4], %s304_s11 }
 0x15e   : > { %1149 = vtanh.f32 %v658_v63  ;;  %v738_v55 = vadd.f32 %v737_v46, %v735_v49  ;;  %s810_s17 = sshll.u32 %s806_s15, 4  ;;  %s811_s17 = int_to_ptr.hbm [resolvable:$true] %s810_s17 }
 0x15f   : > { %1151 = vtanh.f32 %v668_v5  ;;  %v642_v17 = vadd.f32 %v641_v15, %v632_v12  ;;  %s1202_s19 = sshra.s32 %s811_s17, 4  ;;  %s1203_s19 = int_to_ptr.hbm [resolvable:$true] %s1202_s19 }
 0x160   : > { %s1204_s20 = scalar_lea.hbm %s1203_s19, 8  ;;  %p1209_p5 = scmp.lt.s32.totalorder %s1203_s19, %s1593_s6 }
 0x161   : > { %p1205_p1 = scmp.ne.s32.totalorder %s1203_s19, %s1204_s20 }
 0x163   : > { %v1148_v9 = vpop.eup %1147  ;;  %v675_v7 = vpop.permute.xlu1 %674  ;;  %p1206_p2 = pnand %p1205_p1, %p1380_p4 }
 0x164   : > { %v678_v13 = vadd.f32 %v677_v3, %v675_v7  ;;  %v651_v16 = vmul.f32 %v1148_v9, %v650_v11  ;;  %v1150_v18 = vpop.eup %1149 }
 0x165   : > { %v1152_v24 = vpop.eup %1151  ;;  %v661_v25 = vmul.f32 %v1150_v18, %v660_v19  ;;  %p1207_p3 = pneg %p1206_p2 }
 0x166   : > { %1153 = vtanh.f32 %v678_v13  ;;  %v652_v22 = vadd.f32 %v651_v16, %v642_v17  ;;  %v671_v35 = vmul.f32 %v1152_v24, %v670_v29 }
 0x167   : > { %1155 = vtanh.f32 %v688_v20 }
 0x168   : > { %v662_v32 = vadd.f32 %v661_v25, %v652_v22 }
 0x16a   : > { %v672_v38 = vadd.f32 %v671_v35, %v662_v32 }
 0x16c   : > { %v695_v27 = vpop.permute.xlu1 %694  ;;  %v1154_v28 = vpop.eup %1153 }
 0x16d   : > { %v698_v31 = vadd.f32 %v697_v21, %v695_v27  ;;  %v681_v37 = vmul.f32 %v1154_v28, %v680_v30  ;;  %v1156_v39 = vpop.eup %1155  ;;  %v323_v21 = vld [vmem:[%s310_s8] sm:$0xff]  ;;  %s1208_s8 = scalar_lea.hbm %s1593_s6, 16 }
 0x16e   : > { %v691_v48 = vmul.f32 %v1156_v39, %v690_v41  ;;  %788 = vmatpush.msra.mxu2 %v323_v21  ;;  %p1210_p6 = scmp.lt.s32.totalorder %s1208_s8, %s1204_s20 }
 0x16f   : > { %1157 = vtanh.f32 %v698_v31  ;;  %v682_v43 = vadd.f32 %v681_v37, %v672_v38 }
 0x170   : > { %1159 = vtanh.f32 %v708_v34  ;;  %p1211_p7 = por %p1210_p6, %p1209_p5 }
 0x171   : > { %1161 = vtanh.f32 %v718_v40  ;;  %v692_v52 = vadd.f32 %v691_v48, %v682_v43 }
 0x172   : > { %p1212_p9 = pnand %p1211_p7, %p1207_p3 }
 0x175   : > { %v1158_v45 = vpop.eup %1157  ;;  %v725_v47 = vpop.permute.xlu1 %724 }
 0x176   : > { %v701_v50 = vmul.f32 %v1158_v45, %v700_v42  ;;  %v728_v51 = vadd.f32 %v727_v44, %v725_v47  ;;  %v1160_v53 = vpop.eup %1159 }
 0x177   : > { %v711_v57 = vmul.f32 %v1160_v53, %v710_v54  ;;  %v1162_v58 = vpop.eup %1161 }
 0x178   : > { %1163 = vtanh.f32 %v728_v51  ;;  %v702_v56 = vadd.f32 %v701_v50, %v692_v52  ;;  %v721_v3 = vmul.f32 %v1162_v58, %v720_v59 }
 0x179   : > { %1165 = vtanh.f32 %v738_v55 }
 0x17a   : > { %v712_v63 = vadd.f32 %v711_v57, %v702_v56 }
 0x17c   : > { %v722_v5 = vadd.f32 %v721_v3, %v712_v63 }
 0x17e   : > { %v1164_v62 = vpop.eup %1163  ;;  %v745_v1 = vpop.permute.xlu1 %744 }
 0x17f   : > { %v748_v2 = vadd.f32 %v747_v61, %v745_v1  ;;  %v731_v4 = vmul.f32 %v1164_v62, %v730_v60  ;;  %v1166_v6 = vpop.eup %1165 }
 0x180   : > { %v741_v11 = vmul.f32 %v1166_v6, %v740_v8 }
 0x181   : > { %1167 = vtanh.f32 %v748_v2  ;;  %v732_v9 = vadd.f32 %v731_v4, %v722_v5 }
 0x183   : > { %v742_v12 = vadd.f32 %v741_v11, %v732_v9 }
 0x187   : > { %v1168_v7 = vpop.eup %1167 }
 0x188   : > { %v751_v13 = vmul.f32 %v1168_v7, %v750_v10 }
 0x18a   : > { %v752_v14 = vadd.f32 %v751_v13, %v742_v12 }
 0x18c   : > { %754 = vst.msk [vmem:[#allocation2] sm:$0xff] %vm753_vm2, %v752_v14 }
 0x193   : > { %v755_v0 = vld [vmem:[#allocation2] sm:$0xff] }
 0x194   : > { %v756_v15 = vsel %vm753_vm2, %v755_v0, -inf }
 0x195   : > { %757 = vmax.xlane.f32.xlu2 %v756_v15 }
 0x208   : > { %v758_v16 = vpop.xlane.xlu2 %757 }
 0x209   : > { %v759_v17 = vsub.f32 %v755_v0, %v758_v16 }
 0x20b   : > { %v760_v18 = vmul.f32 1.442695, %v759_v17 }
 0x20d   : > { %1169 = vpow2.f32 %v760_v18 }
 0x213   : > { %v1170_v19 = vpop.eup %1169 }
 0x214   : > { %v762_v20 = vsel %vm753_vm2, %v1170_v19, 0.0 }
 0x215   : > { %763 = vadd.xlane.f32.xlu0 %v762_v20 }
 0x288   : > { %v764_v22 = vpop.xlane.xlu0 %763 }
 0x289   : > { %1171 = vrcp.f32 %v764_v22 }
 0x28f   : > { %v1172_v23 = vpop.eup %1171 }
 0x290   : > { %v766_v24 = vmul.f32 %v1172_v23, %v764_v22 }
 0x292   : > { %v767_v25 = vsub.f32 2.0, %v766_v24 }
 0x294   : > { %v768_v26 = vmul.f32 %v1172_v23, %v767_v25 }
 0x296   : > { %v769_v27 = vmul.f32 %v1170_v19, %v768_v26 }
 0x298   : > { %966 = vmatmul.msk.f32.vlgmr.msra.gmra.mxu2 %vm753_vm2, %v769_v27 }
 0x31b   : > { %v790_v28 = vpop.f32.mrf.mxu2 }
 0x31c   : > { %793 = vst.msk [vmem:[%s306_s28] sm:$0xff] %vm334_vm1, %v790_v28 }
 0x31d   : > { %1215 = shalt.err (!%p1212_p9)
}
 0x31e   : > { %978 = dma.vmem_to_hbm [thread:$0]  (%p1380_p4), %s809_s16, 128, %s811_s17, %s795_s18  }
 0x31f PF: > { %p990_p10 = scmp.ge.s32.totalorder %s1270_s26, 2  ;;  %s822_s11 = sand.u32 1, %s1250_s21  }
 0x320   : > { %s823_s27 = scalar_lea.sflag [#allocation4], %s822_s11 }
 0x321   : > { %p985_p11 = pnand %p990_p10, %p1387_p8 }
 0x323   : > { %p986_p12 = pneg %p985_p11 }
 0x325   : > { %1245 = dma.done.wait (%p986_p12), %s823_s27, 128  }
 0x326   : > { %1247 = vsyncadd (%p986_p12), %s823_s27, 4294967168  ;;  %s20_s26 = sadd.s32 1, %s1270_s26   ;;  %s1596_s21 = smov %s1254_s22 }
 0x327   : > { %p17_p13 = scmp.ge.s32.totalorder %s20_s26, 4   ;;  %s1597_s22 = smov %s1258_s23 }
 0x328   : > { %s1598_s23 = smov %s1393_s10  ;;  %s1599_s24 = smov %s1266_s25 }
 0x329   : > { %s1600_s25 = smov %s1602_s29  ;;  %19 = sbr.rel (!%p17_p13) target bundleno = 5 (0x5), region = 90 }
 0x32e   :  { %829 = vsyncpa [#allocation4], 1 }
 0x32f   :  { %831 = vsyncpa [#allocation4 + $0x1], 1 }
 0x330   :  { %832 = vsyncpa [#allocation5], 1 }
 0x331   :  { %834 = vsyncpa [#allocation5 + $0x1], 1 }

</bundles_post_ra>
